<compile_context>
chip_gen: v5e
topology: v5e:2x2
jax: 0.10.0
libtpu: 0.0.40
codegen_flags: <defaults>
</compile_context>

<pallas_src>
import functools

import jax
import jax.numpy as jnp
from jax.experimental import pallas as pl
from jax.experimental.pallas import tpu as pltpu


def _round_up(x, m):
    return ((x + m - 1) // m) * m


def _pick_tiles(n_rows, n_keys, d_pad, elt, is_bf16, budget):
    """Pick (tile_n, tile_k) so streamed blocks + scratch + f32 temps fit budget."""
    n_align = 16 if is_bf16 else 8
    tile_n = min(512, _round_up(n_rows, n_align))
    tile_k = min(1024, _round_up(n_keys, 128))

    def vmem_need(tn, tk):
        stream = 2 * (tn * d_pad * elt      # q tile (double buffered)
                      + tk * d_pad * elt    # k tile
                      + tn * tk * 2         # bf16 mask tile
                      + 8 * 128 * 4)        # per-tile loss block
        scratch = tn * d_pad * elt + 2 * tn * 128 * 4
        temps = 3 * tn * tk * 4             # sim / e / e*m f32 temporaries
        return stream + scratch + temps

    while vmem_need(tile_n, tile_k) > budget:
        if tile_k > 128 and (tile_k >= tile_n or tile_n <= n_align):
            tile_k = _round_up(tile_k // 2, 128)
        elif tile_n > n_align:
            tile_n = max(n_align, _round_up(tile_n // 2, n_align))
        else:
            break  # both at minimum; rely on the generous vmem_limit
    return tile_n, tile_k


def _mask_infonce_kernel(q_ref, kn_ref, mask_ref, out_ref,
                         qn_ref, pos_acc, tot_acc,
                         *, inv_tau, n_valid, pad_keys, tile_n):
    # q_ref:    (tile_n, D_pad)    input dtype, resident across the key axis
    # kn_ref:   (tile_k, D_pad)    input dtype, already L2-normalized (wrapper)
    # mask_ref: (tile_n, tile_k)   bfloat16, zero outside the real (M, Nk) window
    # out_ref:  (8, 128)           f32, per-N-tile partial loss sum (lane dense)
    # qn_ref:   (tile_n, D_pad)    scratch, normalized q (computed at j == 0)
    # pos_acc / tot_acc: (tile_n, 1) f32 scratch accumulators
    i = pl.program_id(0)
    j = pl.program_id(1)
    nj = pl.num_programs(1)

    @pl.when(j == 0)
    def _():
        q = q_ref[...].astype(jnp.float32)
        q_ss = jnp.sum(q * q, axis=-1, keepdims=True)
        # F.normalize(p=2, dim=1): x * rsqrt(max(sum(x^2), 1e-24))  (EUP rsqrt)
        qn_ref[...] = (q * jax.lax.rsqrt(jnp.maximum(q_ss, 1e-24))).astype(qn_ref.dtype)
        pos_acc[...] = jnp.zeros_like(pos_acc)
        tot_acc[...] = jnp.zeros_like(tot_acc)

    # sim tile on the MXU with an f32 accumulator; 1/tau applied in f32.
    sim = jax.lax.dot_general(
        qn_ref[...], kn_ref[...], (((1,), (1,)), ((), ())),
        preferred_element_type=jnp.float32)            # (tile_n, tile_k)
    e = jnp.exp(sim * inv_tau)
    m = mask_ref[...].astype(jnp.float32)

    pos_acc[...] += jnp.sum(e * m, axis=-1, keepdims=True)
    tot_acc[...] += jnp.sum(e, axis=-1, keepdims=True)  # includes padded columns

    @pl.when(j == nj - 1)
    def _():
        pos = pos_acc[...]
        # Padded kn rows are exactly zero -> sim = 0 -> e = 1 per padded column;
        # subtract that compile-time constant instead of a per-element where().
        total = jnp.maximum(tot_acc[...] - float(pad_keys), pos)
        loss = -jnp.log(pos / (total + 1e-8) + 1e-8)    # (tile_n, 1)
        # Zero out padded rows (beyond the real N) before the tile reduction.
        row = jax.lax.broadcasted_iota(jnp.int32, (tile_n, 1), 0) + i * tile_n
        loss = jnp.where(row < n_valid, loss, 0.0)
        tile_loss = jnp.sum(loss)
        out_ref[...] = jnp.zeros(out_ref.shape, jnp.float32) + tile_loss


def mask_infonce_loss(q, k, mask, tau=0.05, margin=1.0, tile_n=None, tile_k=None):
    """Pallas implementation of MaskInfoNCELoss.forward (margin is unused in the
    reference forward as well)."""
    del margin  # unused, kept for signature parity with the PyTorch module
    N = q.shape[0]
    Nk = k.shape[0]
    q2 = q.reshape(N, -1)          # same flatten order as torch .view(N, -1)
    k2 = k.reshape(Nk, -1)
    D = q2.shape[1]
    M = mask.shape[0]

    in_dtype = q2.dtype
    is_bf16 = in_dtype == jnp.bfloat16
    elt = jnp.dtype(in_dtype).itemsize

    # --- k L2-normalization hoisted out of the grid loop (done once, in XLA) ---
    k_f32 = k2.astype(jnp.float32)
    kn = k_f32 * jax.lax.rsqrt(
        jnp.maximum(jnp.sum(k_f32 * k_f32, axis=1, keepdims=True), 1e-24))
    kn = kn.astype(in_dtype)

    # --- generation-aware VMEM budget -----------------------------------------
    try:
        vmem_cap = int(pltpu.get_tpu_info().vmem_capacity_bytes)
    except Exception:
        vmem_cap = 64 * 1024 * 1024        # conservative (v7x per-core)
    budget = int(vmem_cap * 0.6)
    vmem_limit = int(min(vmem_cap * 0.85, 112 * 1024 * 1024))

    # Lane-dense feature axis (zero features change neither norms nor dots).
    D_pad = _round_up(D, 128)

    if tile_n is None or tile_k is None:
        auto_n, auto_k = _pick_tiles(N, Nk, D_pad, elt, is_bf16, budget)
        tile_n = auto_n if tile_n is None else tile_n
        tile_k = auto_k if tile_k is None else tile_k

    N_pad = _round_up(N, tile_n)
    Nk_pad = _round_up(Nk, tile_k)
    grid_n = N_pad // tile_n
    grid_k = Nk_pad // tile_k
    pad_keys = Nk_pad - Nk

    q_p = jnp.zeros((N_pad, D_pad), in_dtype).at[:N, :D].set(q2)
    kn_p = jnp.zeros((Nk_pad, D_pad), in_dtype).at[:Nk, :D].set(kn)
    # torch.cat((mask, zeros), dim=0), streamed in bf16 (exact for 0/1 values);
    # everything outside the original (M, Nk) window is zero.
    mask_p = jnp.zeros((N_pad, Nk_pad), jnp.bfloat16).at[:M, :Nk].set(
        mask.astype(jnp.bfloat16))

    kernel = functools.partial(
        _mask_infonce_kernel,
        inv_tau=1.0 / tau, n_valid=N, pad_keys=pad_keys, tile_n=tile_n)

    out = pl.pallas_call(
        kernel,
        out_shape=jax.ShapeDtypeStruct((grid_n * 8, 128), jnp.float32),
        grid=(grid_n, grid_k),
        in_specs=[
            pl.BlockSpec((tile_n, D_pad), lambda i, j: (i, 0)),   # q row tile
            pl.BlockSpec((tile_k, D_pad), lambda i, j: (j, 0)),   # normalized k tile
            pl.BlockSpec((tile_n, tile_k), lambda i, j: (i, j)),  # bf16 mask tile
        ],
        out_specs=pl.BlockSpec((8, 128), lambda i, j: (i, 0)),
        scratch_shapes=[
            pltpu.VMEM((tile_n, D_pad), in_dtype),   # normalized q (per N-tile)
            pltpu.VMEM((tile_n, 1), jnp.float32),    # pos accumulator
            pltpu.VMEM((tile_n, 1), jnp.float32),    # total accumulator
        ],
        compiler_params=pltpu.CompilerParams(
            dimension_semantics=("parallel", "arbitrary"),
            vmem_limit_bytes=vmem_limit,
        ),
    )(q_p, kn_p, mask_p)

    # One scalar per N-tile (written lane-dense); tiny final reduce in XLA.
    per_tile = out.reshape(grid_n, 8, 128)[:, 0, 0]
    return jnp.sum(per_tile) / N


def _ref_loss(q, k, mask, tau):
    """Pure-JAX reference with the exact PyTorch-module math."""
    N = q.shape[0]
    q2 = q.reshape(N, -1)
    k2 = k.reshape(k.shape[0], -1)
    qn = q2 / jnp.maximum(jnp.linalg.norm(q2, axis=1, keepdims=True), 1e-12)
    kn = k2 / jnp.maximum(jnp.linalg.norm(k2, axis=1, keepdims=True), 1e-12)
    sim = qn @ kn.T
    M = mask.shape[0]
    mask_pos = jnp.concatenate(
        [mask.astype(sim.dtype), jnp.zeros((N - M, sim.shape[1]), sim.dtype)], axis=0)
    e = jnp.exp(sim / tau)
    pos = jnp.sum(e * mask_pos, axis=1)
    neg = jnp.sum(e * (1.0 - mask_pos), axis=1)
    return jnp.mean(-jnp.log(pos / (neg + pos + 1e-8) + 1e-8))


if __name__ == "__main__":
    key = jax.random.PRNGKey(0)
    tau = 0.05

    # --- Test 1: small NCHW feature maps (single grid step) -------------------
    kq, kk, km = jax.random.split(key, 3)
    N, C, H, W = 8, 4, 4, 4
    M = 6  # mask has fewer rows than N -> exercises the zero-row concat branch
    q = jax.random.normal(kq, (N, C, H, W), dtype=jnp.float32)
    k = jax.random.normal(kk, (N, C, H, W), dtype=jnp.float32)
    mask = (jax.random.uniform(km, (M, N)) < 0.5).astype(jnp.float32)

    loss = mask_infonce_loss(q, k, mask, tau=tau)
    jax.block_until_ready(loss)
    ref = _ref_loss(q, k, mask, tau)
    assert jnp.allclose(loss, ref, rtol=5e-4, atol=5e-4), (loss, ref)

    # --- Test 2: forced small tiles -> multi-step (N x key) grid --------------
    kq2, kk2, km2 = jax.random.split(jax.random.PRNGKey(1), 3)
    N2, C2, H2, W2 = 144, 4, 4, 4
    M2 = 100
    q2 = jax.random.normal(kq2, (N2, C2, H2, W2), dtype=jnp.float32)
    k2 = jax.random.normal(kk2, (N2, C2, H2, W2), dtype=jnp.float32)
    mask2 = (jax.random.uniform(km2, (M2, N2)) < 0.5).astype(jnp.float32)

    loss2 = mask_infonce_loss(q2, k2, mask2, tau=tau, tile_n=32, tile_k=128)
    jax.block_until_ready(loss2)
    ref2 = _ref_loss(q2, k2, mask2, tau)
    assert jnp.allclose(loss2, ref2, rtol=2e-3, atol=2e-3), (loss2, ref2)

    print("KERNEL_OK")
</pallas_src>

<mosaic_0001>
module attributes {stable_mosaic.version = 11 : i64} {
  func.func @_mask_infonce_kernel(%arg0: i32, %arg1: i32, %arg2: memref<8x128xf32, #tpu.memory_space<vmem>>, %arg3: memref<128x128xf32, #tpu.memory_space<vmem>>, %arg4: memref<8x128xbf16, #tpu.memory_space<vmem>>, %arg5: memref<8x128xf32, #tpu.memory_space<vmem>>, %arg6: memref<8x128xf32, #tpu.memory_space<vmem>>, %arg7: memref<8x1xf32, #tpu.memory_space<vmem>>, %arg8: memref<8x1xf32, #tpu.memory_space<vmem>>) attributes {dimension_semantics = [#tpu.dimension_semantics<parallel>, #tpu.dimension_semantics<arbitrary>], iteration_bounds = array<i64: 1, 1>, scalar_prefetch = 0 : i64, scratch_operands = 3 : i64, tpu.core_type = #tpu.core_type<tc>, window_params = [{transform_indices = @transform_0, window_bounds = array<i64: 8, 128>}, {transform_indices = @transform_1, window_bounds = array<i64: 128, 128>}, {transform_indices = @transform_2, window_bounds = array<i64: 8, 128>}, {transform_indices = @transform_3, window_bounds = array<i64: 8, 128>}]} {
    %c0_i32 = arith.constant 0 : i32
    %0 = arith.cmpi eq, %arg1, %c0_i32 : i32
    %1 = arith.extui %0 : i1 to i32
    %c0_i32_0 = arith.constant 0 : i32
    %2 = arith.cmpi ne, %1, %c0_i32_0 : i32
    scf.if %2 {
      %c0_19 = arith.constant 0 : index
      %c0_20 = arith.constant 0 : index
      %25 = vector.load %arg2[%c0_19, %c0_20] : memref<8x128xf32, #tpu.memory_space<vmem>>, vector<8x128xf32>
      %26 = arith.mulf %25, %25 : vector<8x128xf32>
      %cst_21 = arith.constant dense<0.000000e+00> : vector<8xf32>
      %27 = vector.multi_reduction <add>, %26, %cst_21 [1] : vector<8x128xf32> to vector<8xf32>
      %28 = vector.shape_cast %27 : vector<8xf32> to vector<8x1xf32>
      %cst_22 = arith.constant 1.000000e-24 : f32
      %29 = vector.broadcast %cst_22 : f32 to vector<8x1xf32>
      %30 = arith.maximumf %28, %29 : vector<8x1xf32>
      %31 = math.rsqrt %30 : vector<8x1xf32>
      %32 = vector.broadcast %31 : vector<8x1xf32> to vector<8x128xf32>
      %33 = arith.mulf %25, %32 : vector<8x128xf32>
      %c0_23 = arith.constant 0 : index
      %c0_24 = arith.constant 0 : index
      %34 = vector.load %arg6[%c0_23, %c0_24] : memref<8x128xf32, #tpu.memory_space<vmem>>, vector<8x128xf32>
      tpu.vector_store %arg6[%c0_23, %c0_24], %33 {strides = array<i32>} : memref<8x128xf32, #tpu.memory_space<vmem>>, vector<8x128xf32>,
      %cst_25 = arith.constant 0.000000e+00 : f32
      %35 = vector.broadcast %cst_25 : f32 to vector<8x1xf32>
      %c0_26 = arith.constant 0 : index
      %c0_27 = arith.constant 0 : index
      %36 = vector.load %arg7[%c0_26, %c0_27] : memref<8x1xf32, #tpu.memory_space<vmem>>, vector<8x1xf32>
      tpu.vector_store %arg7[%c0_26, %c0_27], %35 {strides = array<i32>} : memref<8x1xf32, #tpu.memory_space<vmem>>, vector<8x1xf32>,
      %cst_28 = arith.constant 0.000000e+00 : f32
      %37 = vector.broadcast %cst_28 : f32 to vector<8x1xf32>
      %c0_29 = arith.constant 0 : index
      %c0_30 = arith.constant 0 : index
      %38 = vector.load %arg8[%c0_29, %c0_30] : memref<8x1xf32, #tpu.memory_space<vmem>>, vector<8x1xf32>
      tpu.vector_store %arg8[%c0_29, %c0_30], %37 {strides = array<i32>} : memref<8x1xf32, #tpu.memory_space<vmem>>, vector<8x1xf32>,
    } else {
    }
    %c0 = arith.constant 0 : index
    %c0_1 = arith.constant 0 : index
    %3 = vector.load %arg6[%c0, %c0_1] : memref<8x128xf32, #tpu.memory_space<vmem>>, vector<8x128xf32>
    %c0_2 = arith.constant 0 : index
    %c0_3 = arith.constant 0 : index
    %4 = vector.load %arg3[%c0_2, %c0_3] : memref<128x128xf32, #tpu.memory_space<vmem>>, vector<128x128xf32>
    %cst = arith.constant dense<0.000000e+00> : vector<8x128xf32>
    %5 = tpu.matmul %3, %4, %cst {dimension_numbers = #tpu.dot_dimension_numbers<[1], [1], [0], [0], [0, 0, 1, 0], [], []>} : vector<8x128xf32>, vector<128x128xf32>, vector<8x128xf32> -> vector<8x128xf32>
    %cst_4 = arith.constant 2.000000e+01 : f32
    %6 = vector.broadcast %cst_4 : f32 to vector<8x128xf32>
    %7 = arith.mulf %5, %6 : vector<8x128xf32>
    %8 = math.exp %7 : vector<8x128xf32>
    %c0_5 = arith.constant 0 : index
    %c0_6 = arith.constant 0 : index
    %9 = vector.load %arg4[%c0_5, %c0_6] : memref<8x128xbf16, #tpu.memory_space<vmem>>, vector<8x128xbf16>
    %10 = arith.extf %9 : vector<8x128xbf16> to vector<8x128xf32>
    %c0_7 = arith.constant 0 : index
    %c0_8 = arith.constant 0 : index
    %11 = vector.load %arg7[%c0_7, %c0_8] : memref<8x1xf32, #tpu.memory_space<vmem>>, vector<8x1xf32>
    %12 = arith.mulf %8, %10 : vector<8x128xf32>
    %cst_9 = arith.constant dense<0.000000e+00> : vector<8xf32>
    %13 = vector.multi_reduction <add>, %12, %cst_9 [1] : vector<8x128xf32> to vector<8xf32>
    %14 = vector.shape_cast %13 : vector<8xf32> to vector<8x1xf32>
    %15 = arith.addf %11, %14 : vector<8x1xf32>
    %c0_10 = arith.constant 0 : index
    %c0_11 = arith.constant 0 : index
    %16 = vector.load %arg7[%c0_10, %c0_11] : memref<8x1xf32, #tpu.memory_space<vmem>>, vector<8x1xf32>
    tpu.vector_store %arg7[%c0_10, %c0_11], %15 {strides = array<i32>} : memref<8x1xf32, #tpu.memory_space<vmem>>, vector<8x1xf32>,
    %c0_12 = arith.constant 0 : index
    %c0_13 = arith.constant 0 : index
    %17 = vector.load %arg8[%c0_12, %c0_13] : memref<8x1xf32, #tpu.memory_space<vmem>>, vector<8x1xf32>
    %cst_14 = arith.constant dense<0.000000e+00> : vector<8xf32>
    %18 = vector.multi_reduction <add>, %8, %cst_14 [1] : vector<8x128xf32> to vector<8xf32>
    %19 = vector.shape_cast %18 : vector<8xf32> to vector<8x1xf32>
    %20 = arith.addf %17, %19 : vector<8x1xf32>
    %c0_15 = arith.constant 0 : index
    %c0_16 = arith.constant 0 : index
    %21 = vector.load %arg8[%c0_15, %c0_16] : memref<8x1xf32, #tpu.memory_space<vmem>>, vector<8x1xf32>
    tpu.vector_store %arg8[%c0_15, %c0_16], %20 {strides = array<i32>} : memref<8x1xf32, #tpu.memory_space<vmem>>, vector<8x1xf32>,
    %c0_i32_17 = arith.constant 0 : i32
    %22 = arith.cmpi eq, %arg1, %c0_i32_17 : i32
    %23 = arith.extui %22 : i1 to i32
    %c0_i32_18 = arith.constant 0 : i32
    %24 = arith.cmpi ne, %23, %c0_i32_18 : i32
    scf.if %24 {
      %c0_19 = arith.constant 0 : index
      %c0_20 = arith.constant 0 : index
      %25 = vector.load %arg7[%c0_19, %c0_20] : memref<8x1xf32, #tpu.memory_space<vmem>>, vector<8x1xf32>
      %c0_21 = arith.constant 0 : index
      %c0_22 = arith.constant 0 : index
      %26 = vector.load %arg8[%c0_21, %c0_22] : memref<8x1xf32, #tpu.memory_space<vmem>>, vector<8x1xf32>
      %cst_23 = arith.constant 1.200000e+02 : f32
      %27 = vector.broadcast %cst_23 : f32 to vector<8x1xf32>
      %28 = arith.subf %26, %27 : vector<8x1xf32>
      %29 = arith.maximumf %28, %25 : vector<8x1xf32>
      %cst_24 = arith.constant 9.99999993E-9 : f32
      %30 = vector.broadcast %cst_24 : f32 to vector<8x1xf32>
      %31 = arith.addf %29, %30 : vector<8x1xf32>
      %32 = arith.divf %25, %31 : vector<8x1xf32>
      %cst_25 = arith.constant 9.99999993E-9 : f32
      %33 = vector.broadcast %cst_25 : f32 to vector<8x1xf32>
      %34 = arith.addf %32, %33 : vector<8x1xf32>
      %35 = math.log %34 : vector<8x1xf32>
      %cst_26 = arith.constant 0.000000e+00 : f32
      %36 = vector.broadcast %cst_26 : f32 to vector<8x1xf32>
      %37 = arith.subf %36, %35 : vector<8x1xf32>
      %38 = tpu.iota {dimensions = array<i32: 0>} : vector<8x1xi32>
      %c8_i32 = arith.constant 8 : i32
      %39 = arith.muli %arg0, %c8_i32 : i32
      %40 = vector.broadcast %39 : i32 to vector<8x1xi32>
      %41 = arith.addi %38, %40 : vector<8x1xi32>
      %c8_i32_27 = arith.constant 8 : i32
      %42 = vector.broadcast %c8_i32_27 : i32 to vector<8x1xi32>
      %43 = arith.cmpi slt, %41, %42 : vector<8x1xi32>
      %cst_28 = arith.constant 0.000000e+00 : f32
      %44 = vector.broadcast %cst_28 : f32 to vector<8x1xf32>
      %45 = arith.select %43, %37, %44 : vector<8x1xi1>, vector<8x1xf32>
      %46 = vector.shape_cast %45 : vector<8x1xf32> to vector<1x8x1xf32>
      %cst_29 = arith.constant dense<0.000000e+00> : vector<1xf32>
      %47 = vector.multi_reduction <add>, %46, %cst_29 [1, 2] : vector<1x8x1xf32> to vector<1xf32>
      %48 = vector.shape_cast %47 : vector<1xf32> to vector<1x1x1xf32>
      %49 = vector.extract %48[0, 0, 0] : f32 from vector<1x1x1xf32>
      %cst_30 = arith.constant 0.000000e+00 : f32
      %50 = vector.broadcast %cst_30 : f32 to vector<8x128xf32>
      %51 = vector.broadcast %49 : f32 to vector<8x128xf32>
      %52 = arith.addf %50, %51 : vector<8x128xf32>
      %c0_31 = arith.constant 0 : index
      %c0_32 = arith.constant 0 : index
      %53 = vector.load %arg5[%c0_31, %c0_32] : memref<8x128xf32, #tpu.memory_space<vmem>>, vector<8x128xf32>
      tpu.vector_store %arg5[%c0_31, %c0_32], %52 {strides = array<i32>} : memref<8x128xf32, #tpu.memory_space<vmem>>, vector<8x128xf32>,
    } else {
    }
    return
  }
  func.func @transform_0(%arg0: i32, %arg1: i32) -> (i32, i32) {
    %c0_i32 = arith.constant 0 : i32
    %c0_i32_0 = arith.constant 0 : i32
    return %arg0, %c0_i32 : i32, i32
  }
  func.func @transform_1(%arg0: i32, %arg1: i32) -> (i32, i32) {
    %c0_i32 = arith.constant 0 : i32
    %c0_i32_0 = arith.constant 0 : i32
    return %arg1, %c0_i32 : i32, i32
  }
  func.func @transform_2(%arg0: i32, %arg1: i32) -> (i32, i32) {
    %c0_i32 = arith.constant 0 : i32
    return %arg0, %arg1 : i32, i32
  }
  func.func @transform_3(%arg0: i32, %arg1: i32) -> (i32, i32) {
    %c0_i32 = arith.constant 0 : i32
    %c0_i32_0 = arith.constant 0 : i32
    return %arg0, %c0_i32 : i32, i32
  }
}

</mosaic_0001>

<bundles_post_ra>
// kernel: tpu_custom_call.1
= control target key start
LH: loop header
LB: loop body
LE: loop exit
PB: predicated region body
PF: predicated region fallthrough
CT: control target
= control target key end

     0   :  { %8 = vsyncpa [#allocation6], 0  ;;  %s365_s0 = inlined_call_operand.hbm [shape: f32[8,128], index: 0, kind: input, shape index: {}]   ;;  %s366_s1 = inlined_call_operand.hbm [shape: f32[128,128], index: 1, kind: input, shape index: {}]   ;;  %s367_s2 = inlined_call_operand.hbm [shape: bf16[8,128], index: 2, kind: input, shape index: {}]   ;;  %s368_s3 = inlined_call_operand.hbm [shape: f32[8,128], index: 3, kind: output, shape index: {}]  }
   0x1   :  { %9 = vsyncpa [#allocation9], 0  ;;  %s26_s14 = sshll.u32 %s366_s1, 4  ;;  %s27_s14 = int_to_ptr.hbm [resolvable:$true] %s26_s14 }
   0x2   :  { %10 = vsyncpa [#allocation7], 0  ;;  %s321_s15 = smov [#allocation8]   ;;  %s16_s19 = sshll.u32 %s365_s0, 4  ;;  %s17_s19 = int_to_ptr.hbm [resolvable:$true] %s16_s19 }
   0x3   :  { %s28_s16 = sshll.u32 %s321_s15, 4  ;;  %s322_s20 = smov 128   ;;  %s29_s16 = int_to_ptr.vmem [resolvable:$true] %s28_s16 }
   0x4   :  { %s323_s21 = smov 8   ;;  %s324_s22 = smov [#allocation5]  }
   0x5   :  { %34 = dma.hbm_to_vmem [thread:$0]  %s27_s14, 2048, %s29_s16, [#allocation9], %s322_s20, %s322_s20, %s323_s21  }
   0x6   :  { %s18_s23 = sshll.u32 %s324_s22, 4  ;;  %s40_s26 = sshll.u32 %s367_s2, 4  ;;  %s19_s23 = int_to_ptr.vmem [resolvable:$true] %s18_s23  ;;  %s41_s26 = int_to_ptr.hbm [resolvable:$true] %s40_s26 }
   0x7   :  { %21 = dma.hbm_to_vmem [thread:$0]  %s17_s19, 128, %s19_s23, [#allocation6]  }
   0x8   :  { %s325_s1 = smov [#allocation10]  }
   0x9   :  { %s42_s27 = sshll.u32 %s325_s1, 4  ;;  %s43_s27 = int_to_ptr.vmem [resolvable:$true] %s42_s27 }
   0xa   :  { %45 = dma.hbm_to_vmem [thread:$0]  %s41_s26, 64, %s43_s27, [#allocation9]  }
   0xb   :  { %315 = dma.done.wait [#allocation6], 128  }
   0xc   :  { %316 = vsyncadd [#allocation6], 4294967168 }
   0xd   :  { %317 = dma.done.wait [#allocation9], 2112  }
   0xe   :  { %318 = vsyncadd [#allocation9], 4294965184  ;;  %v62_v0 = vld [vmem:[#allocation5] sm:$0xff]  ;;  %v97_v3 = vld [vmem:[#allocation8 + $0x70] sm:$0xff]  ;;  %vm79_vm3 = vcmask 7168   ;;  %v326_v28 = vmov 0.0  }
   0xf   :  { %v98_v1 = vld [vmem:[#allocation8 + $0x78] sm:$0xff]  ;;  %v63_v2 = vmul.f32 %v62_v0, %v62_v0  ;;  %v96_v4 = vld [vmem:[#allocation8 + $0x68] sm:$0xff]  ;;  %v95_v5 = vld [vmem:[#allocation8 + $0x60] sm:$0xff]  ;;  %81 = vst.msk [vmem:[#allocation4] sm:$0xff] %vm79_vm3, %v326_v28  ;;  %s327_s0 = smov [#allocation11]   ;;  %s190_s30 = sshll.u32 %s368_s3, 4  ;;  %s191_s30 = int_to_ptr.hbm [resolvable:$true] %s190_s30 }
  0x10   :  { %99 = vmatpush.xpose.msra.mxu0 %v98_v1  ;;  %v94_v6 = vld [vmem:[#allocation8 + $0x58] sm:$0xff]  ;;  %v93_v7 = vld [vmem:[#allocation8 + $0x50] sm:$0xff]  ;;  %v92_v8 = vld [vmem:[#allocation8 + $0x48] sm:$0xff]  ;;  %80 = vst.msk [vmem:[#allocation3] sm:$0xff] %vm79_vm3, %v326_v28  ;;  %s188_s2 = sshll.u32 %s327_s0, 4  ;;  %s189_s2 = int_to_ptr.vmem [resolvable:$true] %s188_s2 }
  0x11   :  { %64 = vadd.xlane.f32.xlu0 %v63_v2  ;;  %v91_v9 = vld [vmem:[#allocation8 + $0x40] sm:$0xff]  ;;  %v90_v10 = vld [vmem:[#allocation8 + $0x38] sm:$0xff]  ;;  %v89_v11 = vld [vmem:[#allocation8 + $0x30] sm:$0xff] }
  0x12   :  { %v88_v12 = vld [vmem:[#allocation8 + $0x28] sm:$0xff]  ;;  %v87_v13 = vld [vmem:[#allocation8 + $0x20] sm:$0xff]  ;;  %v86_v14 = vld [vmem:[#allocation8 + $0x18] sm:$0xff] }
  0x13   :  { %v85_v15 = vld [vmem:[#allocation8 + $0x10] sm:$0xff]  ;;  %v84_v16 = vld [vmem:[#allocation8 + $0x8] sm:$0xff]  ;;  %v83_v17 = vld [vmem:[#allocation8] sm:$0xff] }
  0x14   :  { %100 = vmatpush.xpose.msra.mxu0 %v97_v3  ;;  %v122_v32 = vld [vmem:[#allocation10] sm:$0xf] }
  0x15   :  { %v123_v33 = vunpack.c.l.bf16 %v122_v32 }
  0x16   :  { %v131_v36 = vld [vmem:[#allocation4] sm:$0xff] }
  0x17   :  { %v124_v38 = vld [vmem:[#allocation3] sm:$0xff] }
  0x18   :  { %101 = vmatpush.xpose.msra.mxu0 %v96_v4 }
  0x1c   :  { %102 = vmatpush.xpose.msra.mxu0 %v95_v5 }
  0x20   :  { %103 = vmatpush.xpose.msra.mxu0 %v94_v6 }
  0x24   :  { %104 = vmatpush.xpose.msra.mxu0 %v93_v7 }
  0x28   :  { %105 = vmatpush.xpose.msra.mxu0 %v92_v8 }
  0x2c   :  { %106 = vmatpush.xpose.msra.mxu0 %v91_v9 }
  0x30   :  { %107 = vmatpush.xpose.msra.mxu0 %v90_v10 }
  0x34   :  { %108 = vmatpush.xpose.msra.mxu0 %v89_v11 }
  0x38   :  { %109 = vmatpush.xpose.msra.mxu0 %v88_v12 }
  0x3c   :  { %110 = vmatpush.xpose.msra.mxu0 %v87_v13 }
  0x40   :  { %111 = vmatpush.xpose.msra.mxu0 %v86_v14 }
  0x44   :  { %112 = vmatpush.xpose.msra.mxu0 %v85_v15 }
  0x48   :  { %113 = vmatpush.xpose.msra.mxu0 %v84_v16 }
  0x4c   :  { %114 = vmatpush.xpose.msra.mxu0 %v83_v17 }
  0x84   :  { %v65_v18 = vpop.xlane.xlu0 %64 }
  0x85   :  { %v66_v19 = vmax.f32 %v65_v18, 1e-24 }
  0x87   :  { %211 = vrsqrt.f32 %v66_v19  ;;  %vm73_vm1 = vweird.f32 %v66_v19 }
  0x8d   :  { %v212_v20 = vpop.eup %211 }
  0x8e   :  { %v68_v21 = vmul.f32 %v212_v20, %v66_v19  ;;  %vm74_vm0 = vweird.f32 %v212_v20 }
  0x8f   :  { %vm75_vm2 = vmor %vm73_vm1, %vm74_vm0 }
  0x90   :  { %v69_v22 = vmul.f32 %v212_v20, %v68_v21 }
  0x92   :  { %v70_v23 = vmul.f32 0.5, %v69_v22 }
  0x94   :  { %v71_v24 = vsub.f32 1.5, %v70_v23 }
  0x96   :  { %v72_v25 = vmul.f32 %v212_v20, %v71_v24 }
  0x98   :  { %v76_v26 = vsel %vm75_vm2, %v212_v20, %v72_v25 }
  0x99   :  { %v77_v27 = vmul.f32 %v76_v26, %v62_v0 }
  0x9b   :  { %115 = vmatmul.f32.vlgmr.msra.gmra.mxu0 %v77_v27 }
 0x118   :  { %v116_v29 = vpop.f32.mrf.mxu0 }
 0x119   :  { %v119_v30 = vmul.f32 20.0, %v116_v29 }
 0x11b   :  { %v120_v31 = vmul.f32 1.442695, %v119_v30 }
 0x11d   :  { %213 = vpow2.f32 %v120_v31 }
 0x123   :  { %v214_v34 = vpop.eup %213 }
 0x124   :  { %132 = vadd.xlane.f32.xlu0 %v214_v34  ;;  %v125_v35 = vmul.f32 %v214_v34, %v123_v33 }
 0x126   :  { %126 = vadd.xlane.f32.xlu1 %v125_v35 }
 0x197   :  { %v133_v37 = vpop.xlane.xlu0 %132 }
 0x198   :  { %v134_v39 = vadd.f32 %v133_v37, %v131_v36 }
 0x199   :  { %v127_v40 = vpop.xlane.xlu1 %126 }
 0x19a   :  { %135 = vst.msk [vmem:[#allocation4] sm:$0xff] %vm79_vm3, %v134_v39  ;;  %v128_v41 = vadd.f32 %v127_v40, %v124_v38 }
 0x19c   :  { %130 = vst.msk [vmem:[#allocation3] sm:$0xff] %vm79_vm3, %v128_v41 }
 0x1a1   :  { %v140_v42 = vld [vmem:[#allocation4] sm:$0xff] }
 0x1a2   :  { %v201_v43 = vadd.f32 -120.0, %v140_v42 }
 0x1a3   :  { %v139_v44 = vld [vmem:[#allocation3] sm:$0xff] }
 0x1a4   :  { %v142_v45 = vmax.f32 %v201_v43, %v139_v44 }
 0x1a6   :  { %v143_v46 = vadd.f32 1e-08, %v142_v45 }
 0x1a8   :  { %215 = vrcp.f32 %v143_v46  ;;  %v155_v50 = vand.u32 2147483648, %v143_v46  ;;  %v153_v52 = vand.u32 2147483647, %v143_v46  ;;  %vm149_vm5 = vweird.f32 %v143_v46 }
 0x1aa   :  { %v156_v54 = vor.u32 1.1754944e-38, %v155_v50  ;;  %vm154_vm7 = vcmp.eq.f32.partialorder %v153_v52, 8.507059e+37 }
 0x1ae   :  { %v216_v47 = vpop.eup %215 }
 0x1af   :  { %v145_v48 = vmul.f32 %v216_v47, %v143_v46  ;;  %vm150_vm4 = vweird.f32 %v216_v47 }
 0x1b0   :  { %vm151_vm6 = vmor %vm149_vm5, %vm150_vm4 }
 0x1b1   :  { %v146_v49 = vsub.f32 1.0, %v145_v48 }
 0x1b3   :  { %v147_v51 = vmul.f32 %v216_v47, %v146_v49 }
 0x1b5   :  { %v148_v53 = vadd.f32 %v216_v47, %v147_v51 }
 0x1b7   :  { %v152_v55 = vsel %vm151_vm6, %v216_v47, %v148_v53 }
 0x1b8   :  { %v157_v56 = vsel %vm154_vm7, %v156_v54, %v152_v55 }
 0x1b9   :  { %v158_v57 = vmul.f32 %v157_v56, %v139_v44 }
 0x1bb   :  { %v159_v58 = vadd.f32 1e-08, %v158_v57 }
 0x1bd   :  { %217 = vlog2.f32 %v159_v58 }
 0x1c3   :  { %v218_v59 = vpop.eup %217 }
 0x1c4   :  { %v161_v60 = vmul.f32 0.6931472, %v218_v59 }
 0x1c6   :  { %v162_v61 = vsub.f32 0.0, %v161_v60 }
 0x1c8   :  { %v170_v62 = vsel %vm79_vm3, %v162_v61, 0.0 }
 0x1c9   :  { %171 = vadd.xlane.f32.xlu1 %v170_v62 }
 0x23c   :  { %v172_v63 = vpop.xlane.xlu1 %171 }
 0x23d   :  { %v173_v0 = vrot.slane %v172_v63, 4 }
 0x23f   :  { %v174_v1 = vadd.f32 %v173_v0, %v172_v63 }
 0x241   :  { %v175_v2 = vrot.slane %v174_v1, 2 }
 0x243   :  { %v176_v3 = vadd.f32 %v175_v2, %v174_v1 }
 0x245   :  { %v177_v4 = vrot.slane %v176_v3, 1 }
 0x247   :  { %v178_v5 = vadd.f32 %v177_v4, %v176_v3 }
 0x249   :  { %202 = vpush %v178_v5 }
 0x27a   :  { %s203_s4 = spop %202 }
 0x27b   :  { %v180_v6 = vstv %s203_s4 }
 0x27c   :  { %182 = vst [vmem:[#allocation11] sm:$0xff] %v180_v6 }
 0x27d   :  { %193 = dma.vmem_to_hbm [thread:$0]  %s189_s2, 128, %s191_s30, [#allocation7]  }
 0x27e   :  { %319 = dma.done.wait [#allocation7], 128  }
 0x27f   :  { %320 = vsyncadd [#allocation7], 4294967168 }
 0x280   :  { %198 = vsyncpa [#allocation6], 1 }
 0x281   :  { %199 = vsyncpa [#allocation9], 1 }
 0x282   :  { %200 = vsyncpa [#allocation7], 1 }

</bundles_post_ra>
